<compile_context>
chip_gen: v7x
topology: tpu7x:2x2x1
jax: 0.10.0
libtpu: 0.0.40
codegen_flags: <defaults>
</compile_context>

<pallas_src>
import functools
import math

import jax
import jax.numpy as jnp
from jax.experimental import pallas as pl
from jax.experimental.pallas import tpu as pltpu

LN_EPS = 1e-5  # torch.nn.LayerNorm default

_MAX_TILE_ROWS = 1024   # tiles >= ~512 rows already reach ~85% of HBM roofline


@functools.lru_cache(maxsize=1)
def _vmem_cap_bytes():
    """Physical VMEM capacity of the current chip (fallback: v7x per-TC 64 MiB)."""
    try:
        info = pltpu.get_tpu_info()
        cap = getattr(info, "vmem_capacity_bytes", None)
        if cap:
            return int(cap)
    except Exception:
        pass
    return 64 << 20


def _choose_tile_rows(n_rows, din, dout, cap_bytes):
    """Largest row tile (multiple of 8) that fits the VMEM budget.

    Budget = 0.75*VMEM - resident weight/bias - headroom, split over the
    double-buffered f32 input and output row tiles.
    """
    resident = 2 * din * dout * 2 + 2 * dout * 4          # bf16 W' (2 bufs) + b'
    budget = max(4 << 20, cap_bytes - resident - (8 << 20))
    per_row = 2 * (din + dout) * 4                        # f32 in + f32 out, x2 buffers
    tr = max(8, budget // per_row)
    tr = min(tr, _MAX_TILE_ROWS)
    tr = max(8, (tr // 8) * 8)
    if n_rows <= tr:
        return n_rows                                     # single block covers all rows
    return tr


def _vmem_limit_bytes(tr, din, dout, cap_bytes):
    est = (2 * tr * din * 4          # input row tiles (double-buffered, f32)
           + 2 * tr * dout * 4       # output row tiles
           + 2 * din * dout * 2      # bf16 folded weight (conservatively 2 buffers)
           + 2 * dout * 4)           # bias
    # >= default 32 MiB so larger tiles are legal; <= 75% of this chip's VMEM.
    return int(min(cap_bytes, max(32 << 20, est + (4 << 20))))


# ----------------------------------------------------------------------------
# Pallas kernel: fused LayerNorm(Din) + Linear(Din -> Dout)
# (gamma/beta already folded into w_ref / b_ref)
# ----------------------------------------------------------------------------
def _merge_kernel(x_ref, w_ref, b_ref, o_ref):
    x = x_ref[...].astype(jnp.float32)                      # (TR, Din)
    mean = jnp.mean(x, axis=-1, keepdims=True)
    xc = x - mean                                            # needed for normalize anyway
    var = jnp.mean(xc * xc, axis=-1, keepdims=True)          # two-pass: no cancellation
    y = xc * jax.lax.rsqrt(var + LN_EPS)
    # bf16 operands on the MXU, f32 accumulation.
    out = jnp.dot(y.astype(jnp.bfloat16), w_ref[...],
                  preferred_element_type=jnp.float32)
    o_ref[...] = (out + b_ref[...]).astype(o_ref.dtype)


def _fused_ln_linear(rows, w_folded, b_folded, tile_rows=None, out_dtype=None):
    """rows: (R, Din); w_folded: (Din, Dout) bf16; b_folded: (1, Dout) f32."""
    R, Din = rows.shape
    Din_w, Dout = w_folded.shape
    assert Din_w == Din, (Din_w, Din)
    if out_dtype is None:
        out_dtype = rows.dtype     # keep module semantics (f32 in -> f32 out)

    cap = int(0.75 * _vmem_cap_bytes())
    TR = tile_rows if tile_rows is not None else _choose_tile_rows(R, Din, Dout, cap)
    grid = (pl.cdiv(R, TR),)

    return pl.pallas_call(
        _merge_kernel,
        out_shape=jax.ShapeDtypeStruct((R, Dout), out_dtype),
        grid=grid,
        in_specs=[
            pl.BlockSpec((TR, Din), lambda i: (i, 0)),     # streamed row tiles
            pl.BlockSpec((Din, Dout), lambda i: (0, 0)),   # W' (resident, bf16)
            pl.BlockSpec((1, Dout), lambda i: (0, 0)),     # b' (resident, f32)
        ],
        out_specs=pl.BlockSpec((TR, Dout), lambda i: (i, 0)),
        compiler_params=pltpu.CompilerParams(
            dimension_semantics=("parallel",),
            vmem_limit_bytes=_vmem_limit_bytes(TR, Din, Dout, cap),
        ),
    )(rows, w_folded, b_folded)


# ----------------------------------------------------------------------------
# Parameter prep: fold LayerNorm affine into the Linear (done once at init)
# ----------------------------------------------------------------------------
def fold_ln_affine_into_linear(gamma, beta, w_t, b):
    """(y*gamma + beta) @ W + b  ==  y @ (gamma[:,None]*W) + (beta @ W + b)."""
    gamma = gamma.astype(jnp.float32)
    beta = beta.astype(jnp.float32)
    w_t = w_t.astype(jnp.float32)
    b = b.astype(jnp.float32)
    w_f = (gamma[:, None] * w_t).astype(jnp.bfloat16)        # halves the weight DMA
    b_f = (beta @ w_t + b).reshape(1, -1).astype(jnp.float32)
    return w_f, b_f


# ----------------------------------------------------------------------------
# PatchMerge (glue: repeat/pad/regroup in plain JAX, hot path in Pallas)
# ----------------------------------------------------------------------------
@functools.partial(jax.jit, static_argnames=("n_agg",))
def patch_merge(x, merge_params, *, n_agg):
    B, E, N, D = x.shape
    # TODO(synk): when pad != 0 this concat materializes an extra HBM copy of x;
    # a PrefetchScalarGridSpec patch-offset table could gather the duplicated
    # tail patches directly in the kernel's index_map.
    if N < n_agg:
        reps = math.ceil(n_agg / N)
        x = jnp.tile(x, (1, 1, reps, 1))[:, :, :n_agg, :]
    else:
        pad = N % n_agg
        if pad != 0:
            pad = n_agg - pad
            x = jnp.concatenate([x, x[:, :, -pad:, :]], axis=2)
    Np = x.shape[2]
    Nn = Np // n_agg
    Din = n_agg * D
    # The torch strided-slice + concat(-1) is exactly this contiguous reshape:
    # out[..., j, i*D:(i+1)*D] = x[..., j*n_agg + i, :]
    rows = x.reshape(B * E * Nn, Din)
    out = _fused_ln_linear(rows, merge_params["w_folded"], merge_params["b_folded"])
    return out.reshape(B, E, Nn, D)


# ----------------------------------------------------------------------------
# Encoder / EncoderLayer
# ----------------------------------------------------------------------------
def ba_module(x):
    # TODO(synk): BAModule (Hopfield/entmax attention block) definition is not
    # provided in the module listing; treated as identity here.
    return x


def encoder_layer(x, layer_params):
    if layer_params["merge"] is not None:
        x = patch_merge(x, layer_params["merge"], n_agg=layer_params["n_agg"])
    x = ba_module(x)
    return x


def encoder_forward(x, all_params):
    encode_x = [x]
    for lp in all_params:
        x = encoder_layer(x, lp)
        encode_x.append(x)
    return encode_x


# ----------------------------------------------------------------------------
# Deterministic parameter initialization (torch.nn.Linear / LayerNorm style),
# with all kernel operands pre-baked (folded affine, bf16 weight).
# ----------------------------------------------------------------------------
def init_encoder_params(key, e_layers, n_agg, d_model, dtype=jnp.float32):
    params = []
    # Layer 0: n_agg = 1 -> no PatchMerge
    params.append({"merge": None, "n_agg": 1})
    for _ in range(1, e_layers):
        key, kw, kb = jax.random.split(key, 3)
        din = n_agg * d_model
        bound = 1.0 / math.sqrt(din)
        w = jax.random.uniform(kw, (d_model, din), dtype, -bound, bound)  # torch (out,in)
        b = jax.random.uniform(kb, (d_model,), dtype, -bound, bound)
        gamma = jnp.ones((din,), dtype)
        beta = jnp.zeros((din,), dtype)
        w_t = jnp.asarray(w.T)                              # (Din, Dout) for x @ W.T
        w_f, b_f = fold_ln_affine_into_linear(gamma, beta, w_t, b)
        merge = {
            # raw params (reference / export)
            "ln_gamma": gamma, "ln_beta": beta, "w_t": w_t, "b": b,
            # pre-baked kernel operands
            "w_folded": w_f, "b_folded": b_f,
        }
        params.append({"merge": merge, "n_agg": n_agg})
    return params


# ----------------------------------------------------------------------------
# Pure-JAX reference (f32 matmul) for correctness sanity check
# ----------------------------------------------------------------------------
def _ref_patch_merge(x, p, n_agg):
    B, E, N, D = x.shape
    if N < n_agg:
        reps = math.ceil(n_agg / N)
        x = jnp.tile(x, (1, 1, reps, 1))[:, :, :n_agg, :]
    else:
        pad = N % n_agg
        if pad != 0:
            pad = n_agg - pad
            x = jnp.concatenate([x, x[:, :, -pad:, :]], axis=2)
    Nn = x.shape[2] // n_agg
    y = x.reshape(B, E, Nn, n_agg * D).astype(jnp.float32)
    mean = jnp.mean(y, axis=-1, keepdims=True)
    var = jnp.mean(jnp.square(y - mean), axis=-1, keepdims=True)
    yn = (y - mean) * jax.lax.rsqrt(var + LN_EPS)
    yn = yn * p["ln_gamma"] + p["ln_beta"]
    return (yn @ p["w_t"] + p["b"]).astype(x.dtype)


def _ref_encoder(x, all_params):
    outs = [x]
    for lp in all_params:
        if lp["merge"] is not None:
            x = _ref_patch_merge(x, lp["merge"], lp["n_agg"])
        outs.append(x)
    return outs


# ----------------------------------------------------------------------------
if __name__ == "__main__":
    key = jax.random.PRNGKey(0)
    kx, kp, kt = jax.random.split(key, 3)

    # Small shapes consistent with Encoder's (batch, emb_dim, n_patch, d_model)
    B, E, N, D = 2, 4, 16, 32
    e_layers, n_agg = 3, 4

    x = jax.random.normal(kx, (B, E, N, D), jnp.float32)
    params = init_encoder_params(kp, e_layers, n_agg, D)

    outs = encoder_forward(x, params)
    outs = [jax.block_until_ready(o) for o in outs]

    refs = _ref_encoder(x, params)
    # bf16 MXU matmul with f32 accumulation -> loosened tolerance vs f32 reference
    for o, r in zip(outs, refs):
        assert o.shape == r.shape, (o.shape, r.shape)
        assert jnp.allclose(o, r, atol=2e-2, rtol=2e-2), "mismatch vs reference"

    # Extra check: multi-tile row grid + partial last block + non-trivial affine
    # (exercises the gamma/beta -> W'/b' folding).
    R2, Din2, Dout2 = 40, 128, 32
    kr, kw2, kb2, kg2, kbt2 = jax.random.split(kt, 5)
    rows2 = jax.random.normal(kr, (R2, Din2), jnp.float32)
    g2 = jax.random.uniform(kg2, (Din2,), jnp.float32, 0.5, 1.5)
    bt2 = jax.random.uniform(kbt2, (Din2,), jnp.float32, -0.5, 0.5)
    w2 = jax.random.uniform(kw2, (Din2, Dout2), jnp.float32, -0.1, 0.1)
    bias2 = jax.random.uniform(kb2, (Dout2,), jnp.float32, -0.1, 0.1)
    w2_f, b2_f = fold_ln_affine_into_linear(g2, bt2, w2, bias2)
    got = jax.block_until_ready(
        _fused_ln_linear(rows2, w2_f, b2_f, tile_rows=16))
    mu = rows2.mean(-1, keepdims=True)
    vr = jnp.mean(jnp.square(rows2 - mu), axis=-1, keepdims=True)
    want = ((rows2 - mu) * jax.lax.rsqrt(vr + LN_EPS) * g2 + bt2) @ w2 + bias2
    assert jnp.allclose(got, want, atol=2e-2, rtol=2e-2), "tiled-path mismatch"

    print("KERNEL_OK")
</pallas_src>

<mosaic_0001>
module attributes {stable_mosaic.version = 11 : i64} {
  func.func @_merge_kernel(%arg0: i32, %arg1: memref<32x128xf32, #tpu.memory_space<vmem>>, %arg2: memref<128x32xbf16, #tpu.memory_space<vmem>>, %arg3: memref<1x32xf32, #tpu.memory_space<vmem>>, %arg4: memref<32x32xf32, #tpu.memory_space<vmem>>) attributes {dimension_semantics = [#tpu.dimension_semantics<parallel>], iteration_bounds = array<i64: 1>, scalar_prefetch = 0 : i64, scratch_operands = 0 : i64, tpu.core_type = #tpu.core_type<tc>, window_params = [{transform_indices = @transform_0, window_bounds = array<i64: 32, 128>}, {pipeline_mode = #tpu.pipeline_mode<synchronous>, transform_indices = @transform_1, window_bounds = array<i64: 128, 32>}, {pipeline_mode = #tpu.pipeline_mode<synchronous>, transform_indices = @transform_2, window_bounds = array<i64: 1, 32>}, {transform_indices = @transform_3, window_bounds = array<i64: 32, 32>}]} {
    %c0 = arith.constant 0 : index
    %c0_0 = arith.constant 0 : index
    %0 = vector.load %arg1[%c0, %c0_0] : memref<32x128xf32, #tpu.memory_space<vmem>>, vector<32x128xf32>
    %cst = arith.constant dense<0.000000e+00> : vector<32xf32>
    %1 = vector.multi_reduction <add>, %0, %cst [1] : vector<32x128xf32> to vector<32xf32>
    %2 = vector.shape_cast %1 : vector<32xf32> to vector<32x1xf32>
    %cst_1 = arith.constant 1.280000e+02 : f32
    %3 = vector.broadcast %cst_1 : f32 to vector<32x1xf32>
    %4 = arith.divf %2, %3 : vector<32x1xf32>
    %5 = vector.broadcast %4 : vector<32x1xf32> to vector<32x128xf32>
    %6 = arith.subf %0, %5 : vector<32x128xf32>
    %7 = arith.mulf %6, %6 : vector<32x128xf32>
    %cst_2 = arith.constant dense<0.000000e+00> : vector<32xf32>
    %8 = vector.multi_reduction <add>, %7, %cst_2 [1] : vector<32x128xf32> to vector<32xf32>
    %9 = vector.shape_cast %8 : vector<32xf32> to vector<32x1xf32>
    %cst_3 = arith.constant 1.280000e+02 : f32
    %10 = vector.broadcast %cst_3 : f32 to vector<32x1xf32>
    %11 = arith.divf %9, %10 : vector<32x1xf32>
    %cst_4 = arith.constant 9.99999974E-6 : f32
    %12 = vector.broadcast %cst_4 : f32 to vector<32x1xf32>
    %13 = arith.addf %11, %12 : vector<32x1xf32>
    %14 = math.rsqrt %13 : vector<32x1xf32>
    %15 = vector.broadcast %14 : vector<32x1xf32> to vector<32x128xf32>
    %16 = arith.mulf %6, %15 : vector<32x128xf32>
    %17 = arith.truncf %16 : vector<32x128xf32> to vector<32x128xbf16>
    %c0_5 = arith.constant 0 : index
    %c0_6 = arith.constant 0 : index
    %18 = vector.load %arg2[%c0_5, %c0_6] : memref<128x32xbf16, #tpu.memory_space<vmem>>, vector<128x32xbf16>
    %cst_7 = arith.constant dense<0.000000e+00> : vector<32x32xf32>
    %19 = tpu.matmul %17, %18, %cst_7 {dimension_numbers = #tpu.dot_dimension_numbers<[1], [0], [0], [1], [0, 0, 1, 1], [], []>} : vector<32x128xbf16>, vector<128x32xbf16>, vector<32x32xf32> -> vector<32x32xf32>
    %c0_8 = arith.constant 0 : index
    %c0_9 = arith.constant 0 : index
    %20 = vector.load %arg3[%c0_8, %c0_9] : memref<1x32xf32, #tpu.memory_space<vmem>>, vector<1x32xf32>
    %21 = vector.broadcast %20 : vector<1x32xf32> to vector<32x32xf32>
    %22 = arith.addf %19, %21 : vector<32x32xf32>
    %c0_10 = arith.constant 0 : index
    %c0_11 = arith.constant 0 : index
    %23 = vector.load %arg4[%c0_10, %c0_11] : memref<32x32xf32, #tpu.memory_space<vmem>>, vector<32x32xf32>
    tpu.vector_store %arg4[%c0_10, %c0_11], %22 {strides = array<i32>} : memref<32x32xf32, #tpu.memory_space<vmem>>, vector<32x32xf32>,
    return
  }
  func.func @transform_0(%arg0: i32) -> (i32, i32) {
    %c0_i32 = arith.constant 0 : i32
    %c0_i32_0 = arith.constant 0 : i32
    return %arg0, %c0_i32 : i32, i32
  }
  func.func @transform_1(%arg0: i32) -> (i32, i32) {
    %c0_i32 = arith.constant 0 : i32
    %c0_i32_0 = arith.constant 0 : i32
    %c0_i32_1 = arith.constant 0 : i32
    return %c0_i32, %c0_i32_0 : i32, i32
  }
  func.func @transform_2(%arg0: i32) -> (i32, i32) {
    %c0_i32 = arith.constant 0 : i32
    %c0_i32_0 = arith.constant 0 : i32
    %c0_i32_1 = arith.constant 0 : i32
    return %c0_i32, %c0_i32_0 : i32, i32
  }
  func.func @transform_3(%arg0: i32) -> (i32, i32) {
    %c0_i32 = arith.constant 0 : i32
    %c0_i32_0 = arith.constant 0 : i32
    return %arg0, %c0_i32 : i32, i32
  }
}

</mosaic_0001>

<bundles_post_ra>
// kernel: patch_merge.1
= control target key start
LH: loop header
LB: loop body
LE: loop exit
PB: predicated region body
PF: predicated region fallthrough
CT: control target
= control target key end

     0   :  { %s364_s0 = inlined_call_operand.vmem [shape: f32[32,128], index: 0, kind: input, shape index: {}]   ;;  %s365_s1 = inlined_call_operand.vmem [shape: bf16[128,32], index: 1, kind: input, shape index: {}]   ;;  %s366_s2 = inlined_call_operand.vmem [shape: f32[1,32], index: 2, kind: input, shape index: {}]   ;;  %s367_s3 = inlined_call_operand.hbm [shape: f32[32,32], index: 3, kind: output, shape index: {}]  }
   0x1   :  { %v16_v0 = vld [vmem:[%s364_s0] sm:$0xff]  ;;  %v18_v1 = vld [vmem:[%s364_s0 + $0x10] sm:$0xff]  ;;  %v17_v2 = vld [vmem:[%s364_s0 + $0x8] sm:$0xff] }
   0x2   :  { %20 = vadd.xlane.f32.xlu0 %v16_v0  ;;  %24 = vadd.xlane.f32.xlu1 %v18_v1  ;;  %v19_v3 = vld [vmem:[%s364_s0 + $0x18] sm:$0xff] }
   0x6   :  { %22 = vadd.xlane.f32.xlu0 %v17_v2  ;;  %26 = vadd.xlane.f32.xlu1 %v19_v3 }
   0x7   :  { %8 = vsyncpa [#allocation3], 0  ;;  %v250_v4 = vld [vmem:[%s365_s1] sm:$0xff]   ;;  %v251_v5 = vld [vmem:[%s365_s1 + $0x8] sm:$0xff]   ;;  %vm187_vm0 = vcmask 261120   ;;  %s290_s9 = smov [#allocation2]  }
   0x8   :  { %227 = vmatprep.subr.bf16.mxu0 %v250_v4  ;;  %v252_v22 = vld [vmem:[%s365_s1 + $0x10] sm:$0xff]   ;;  %v253_v23 = vld [vmem:[%s365_s1 + $0x18] sm:$0xff]   ;;  %v254_v24 = vld [vmem:[%s365_s1 + $0x20] sm:$0xff]   ;;  %s197_s10 = sshll.u32 %s290_s9, 4  ;;  %s198_s10 = int_to_ptr.vmem [resolvable:$true] %s197_s10 }
   0x9   :  { %228 = vmatpush3.bf16.msra.mxu0 %v250_v4  ;;  %v255_v25 = vld [vmem:[%s365_s1 + $0x28] sm:$0xff]   ;;  %v256_v26 = vld [vmem:[%s365_s1 + $0x30] sm:$0xff]   ;;  %v257_v27 = vld [vmem:[%s365_s1 + $0x38] sm:$0xff]   ;;  %s266_s11 = scalar_lea.vmem %s198_s10, 512  ;;  %p271_p1 = scmp.lt.s32.totalorder %s198_s10, %s198_s10 }
   0xa   :  { %229 = vmatprep.subr.bf16.mxu0 %v251_v5  ;;  %v208_v50 = vld [vmem:[%s366_s2] ss:$0 sm:$0xff]  ;;  %p267_p0 = scmp.ne.s32.totalorder %s198_s10, %s266_s11  ;;  %p272_p2 = scmp.lt.s32.totalorder %s266_s11, %s266_s11 }
   0xc   :  { %p273_p3 = por %p272_p2, %p271_p1 }
   0xd   :  { %230 = vmatpush3.bf16.msra.mxu0 %v251_v5 }
   0xe   :  { %231 = vmatprep.subr.bf16.mxu0 %v252_v22  ;;  %p274_p4 = pnand %p273_p3, %p267_p0 }
  0x11   :  { %232 = vmatpush3.bf16.msra.mxu0 %v252_v22 }
  0x12   :  { %233 = vmatprep.subr.bf16.mxu0 %v253_v23 }
  0x15   :  { %234 = vmatpush3.bf16.msra.mxu0 %v253_v23 }
  0x16   :  { %235 = vmatprep.subr.bf16.mxu0 %v254_v24 }
  0x19   :  { %236 = vmatpush3.bf16.msra.mxu0 %v254_v24 }
  0x1a   :  { %237 = vmatprep.subr.bf16.mxu0 %v255_v25 }
  0x1d   :  { %238 = vmatpush3.bf16.msra.mxu0 %v255_v25 }
  0x1e   :  { %239 = vmatprep.subr.bf16.mxu0 %v256_v26 }
  0x21   :  { %240 = vmatpush3.bf16.msra.mxu0 %v256_v26 }
  0x22   :  { %241 = vmatprep.subr.bf16.mxu0 %v257_v27 }
  0x25   :  { %242 = vmatpush3.bf16.msra.mxu0 %v257_v27 }
  0x8f   :  { %v21_v6 = vpop.xlane.xlu0 %20  ;;  %v25_v7 = vpop.xlane.xlu1 %24 }
  0x90   :  { %v29_v8 = vmul.f32 0.0078125, %v21_v6  ;;  %v31_v9 = vmul.f32 0.0078125, %v25_v7 }
  0x92   :  { %v33_v10 = vsub.f32 %v16_v0, %v29_v8  ;;  %v35_v11 = vsub.f32 %v18_v1, %v31_v9 }
  0x93   :  { %v23_v12 = vpop.xlane.xlu0 %22  ;;  %v27_v13 = vpop.xlane.xlu1 %26 }
  0x94   :  { %v30_v14 = vmul.f32 0.0078125, %v23_v12  ;;  %v37_v15 = vmul.f32 %v33_v10, %v33_v10  ;;  %v32_v16 = vmul.f32 0.0078125, %v27_v13  ;;  %v39_v19 = vmul.f32 %v35_v11, %v35_v11 }
  0x96   :  { %v34_v17 = vsub.f32 %v17_v2, %v30_v14  ;;  %41 = vadd.xlane.f32.xlu0 %v37_v15  ;;  %v36_v18 = vsub.f32 %v19_v3, %v32_v16 }
  0x98   :  { %v38_v20 = vmul.f32 %v34_v17, %v34_v17  ;;  %v40_v21 = vmul.f32 %v36_v18, %v36_v18 }
  0x9a   :  { %45 = vadd.xlane.f32.xlu0 %v39_v19  ;;  %43 = vadd.xlane.f32.xlu1 %v38_v20 }
  0x9e   :  { %47 = vadd.xlane.f32.xlu1 %v40_v21 }
 0x123   :  { %v42_v28 = vpop.xlane.xlu0 %41 }
 0x124   :  { %v49_v29 = vmul.f32 0.0078125, %v42_v28 }
 0x126   :  { %v53_v30 = vadd.f32 1e-05, %v49_v29 }
 0x127   :  { %v44_v31 = vpop.xlane.xlu1 %43  ;;  %v46_v32 = vpop.xlane.xlu0 %45 }
 0x128   :  { %v50_v33 = vmul.f32 0.0078125, %v44_v31  ;;  %v51_v34 = vmul.f32 0.0078125, %v46_v32  ;;  %258 = vrsqrt.f32 %v53_v30 }
 0x12a   :  { %v54_v35 = vadd.f32 1e-05, %v50_v33  ;;  %v55_v36 = vadd.f32 1e-05, %v51_v34 }
 0x12b   :  { %v48_v37 = vpop.xlane.xlu1 %47 }
 0x12c   :  { %260 = vrsqrt.f32 %v54_v35  ;;  %v52_v38 = vmul.f32 0.0078125, %v48_v37 }
 0x12d   :  { %262 = vrsqrt.f32 %v55_v36 }
 0x12e   :  { %v56_v39 = vadd.f32 1e-05, %v52_v38 }
 0x130   :  { %264 = vrsqrt.f32 %v56_v39 }
 0x132   :  { %v259_v40 = vpop.eup %258 }
 0x133   :  { %v61_v42 = vmul.f32 %v259_v40, %v33_v10 }
 0x136   :  { %v261_v41 = vpop.eup %260 }
 0x137   :  { %v62_v43 = vmul.f32 %v261_v41, %v34_v17  ;;  %v263_v44 = vpop.eup %262 }
 0x138   :  { %v63_v47 = vmul.f32 %v263_v44, %v35_v11 }
 0x139   :  { %v65_v45 = vpack.c.bf16 %v62_v43, %v61_v42 }
 0x13a   :  { %v265_v46 = vpop.eup %264 }
 0x13b   :  { %243 = vmatprep.mubr.bf16.mxu0 %v65_v45  ;;  %v64_v48 = vmul.f32 %v265_v46, %v36_v18 }
 0x13d   :  { %v66_v49 = vpack.c.bf16 %v64_v48, %v63_v47 }
 0x13f   :  { %244 = vmatmul.mubr.bf16.vlgmr.msra.gmra.mrb[0].mxu0 %v66_v49 }
 0x212   :  { %v245_v51 = vpop.f32.mrb[0].mxu0 }
 0x213   :  { %v181_v52 = vadd.f32 %v245_v51, %v208_v50  ;;  %v172_v53 = vpop.f32.mrb[1].mxu0 }
 0x214   :  { %v173_v54 = vadd.f32 %v208_v50, %v172_v53  ;;  %v246_v55 = vpop.f32.mrb[2].mxu0 }
 0x215   :  { %190 = vst.msk [vmem:[#allocation2 + $0x10] sm:$0xff] %vm187_vm0, %v181_v52  ;;  %v184_v56 = vadd.f32 %v246_v55, %v208_v50  ;;  %v175_v57 = vpop.f32.mrb[3].mxu0 }
 0x216   :  { %188 = vst.msk [vmem:[#allocation2] sm:$0xff] %vm187_vm0, %v173_v54  ;;  %v176_v58 = vadd.f32 %v208_v50, %v175_v57 }
 0x217   :  { %191 = vst.msk [vmem:[#allocation2 + $0x18] sm:$0xff] %vm187_vm0, %v184_v56 }
 0x218   :  { %189 = vst.msk [vmem:[#allocation2 + $0x8] sm:$0xff] %vm187_vm0, %v176_v58 }
 0x219   :  { %277 = shalt.err (!%p274_p4)
}
 0x21a   :  { %s278_s13 = scalar_lea.hbm %s367_s3, 512 }
 0x21b   :  { %p279_p5 = scmp.ne.s32.totalorder %s367_s3, %s278_s13  ;;  %p282_p6 = scmp.lt.u32.totalorder %s278_s13, %s367_s3 }
 0x21d   :  { %p284_p7 = pnand %p282_p6, %p279_p5 }
 0x21f   :  { %287 = shalt.err (!%p284_p7)
}
 0x220   :  { %s291_s18 = smov 128   ;;  %s292_s19 = smov 8  }
 0x221   :  { %203 = dma.vmem_to_hbm [thread:$0]  %s198_s10, 512, %s367_s3, [#allocation3], %s291_s18, %s291_s18, %s292_s19  }
 0x222   :  { %288 = dma.done.wait [#allocation3], 512  }
 0x223   :  { %289 = vsyncadd [#allocation3], 4294966784 }
 0x224   :  { %207 = vsyncpa [#allocation3], 1 }

</bundles_post_ra>
